<compile_context>
chip_gen: v7x
topology: tpu7x:2x2x1
jax: 0.10.0
libtpu: 0.0.40
codegen_flags: <defaults>
</compile_context>

<pallas_src>
import jax
import jax.numpy as jnp
import numpy as np
from jax.experimental import pallas as pl
from jax.experimental.pallas import tpu as pltpu

BN_EPS = 1e-5
_VMEM_LIMIT = 32 * 1024 * 1024   # safe on v5e/v6e (128 MiB phys) and v7x (64 MiB phys)


def _round_up(a, b):
    return (a + b - 1) // b * b


def _conv_stats_kernel(x_ref, w_ref, y_ref, s_ref, s2_ref):
    """relu -> single block-diagonal MXU matmul; accumulate global per-channel stats.

    Layout: x_ref (K, tm), w_ref (C_out, K), y_ref (C_out, tm) — lane axis = pixels.
    """
    i = pl.program_id(0)

    @pl.when(i == 0)
    def _init():
        s_ref[...] = jnp.zeros_like(s_ref)
        s2_ref[...] = jnp.zeros_like(s2_ref)

    x = jnp.maximum(x_ref[...], 0)                                     # ReLU (VPU)
    y = jnp.dot(w_ref[...], x, preferred_element_type=jnp.float32)     # MXU, (C_out, tm)
    y_ref[...] = y
    # One-pass fused stats: var = E[y^2] - mean^2 (accumulated in f32, lane-reduce on XLU).
    s_ref[...] += jnp.sum(y, axis=1, keepdims=True)
    s2_ref[...] += jnp.sum(y * y, axis=1, keepdims=True)


def _normalize_kernel(y_ref, scale_ref, shift_ref, out_ref):
    """BN normalize + affine folded into one per-element multiply-add (per-sublane scale)."""
    out_ref[...] = y_ref[...] * scale_ref[...] + shift_ref[...]


def factorized_reduce(x_nchw, w1, w2, gamma, beta, *, tm=512,
                      matmul_dtype=jnp.float32):
    """x_nchw: (N, C_in, H, W) f32.  w1, w2: (C_half, C_in, 1, 1).  gamma/beta: (C_out,).

    tm = pixel-tile width (lane axis), rounded to a multiple of 128.
    matmul_dtype=jnp.bfloat16 halves the dominant x/w DMA bytes on v6e/v7x
    (f32 MXU accumulation, BN math stays f32); keep f32 on v5e / for strict numerics.
    """
    N, C_in, H, W = x_nchw.shape
    C_half = w1.shape[0]
    C_out = 2 * C_half
    assert H % 2 == 0 and W % 2 == 0, "even spatial dims so both branches match"
    Ho, Wo = H // 2, W // 2
    M = N * Ho * Wo
    K = 2 * C_in

    # --- glue: stride-2 taps, channels -> sublanes / pixels -> lanes, stack both conv
    #     branches along the contraction axis so the kernel does ONE matmul.
    # TODO(synk): pull the tap gather + small transpose into the kernel (pl.ANY-resident
    # x + strided pl.ds reads) to avoid materializing x_t in HBM.
    xe = x_nchw[:, :, 0::2, 0::2]                         # conv_1 taps (even, even)
    xo = x_nchw[:, :, 1::2, 1::2]                         # conv_2 taps == x[:,:,1:,1:] stride 2
    xe_t = jnp.transpose(xe, (1, 0, 2, 3)).reshape(C_in, M)
    xo_t = jnp.transpose(xo, (1, 0, 2, 3)).reshape(C_in, M)
    x_t = jnp.concatenate([xe_t, xo_t], axis=0)           # (K, M)

    # Block-diagonal weight: [[w1, 0], [0, w2]] @ [xe; xo] == [w1@xe ; w2@xo].
    w_t = jnp.zeros((C_out, K), jnp.float32)
    w_t = w_t.at[:C_half, :C_in].set(w1.reshape(C_half, C_in))
    w_t = w_t.at[C_half:, C_in:].set(w2.reshape(C_half, C_in))

    x_t = x_t.astype(matmul_dtype)
    w_t = w_t.astype(matmul_dtype)

    # --- tile over pixels (lane-aligned, multiple of 128); pad with zero columns.
    #     Padded columns give exact zeros through relu+matmul, so global sums are
    #     unaffected; divide by the true M.
    tm = _round_up(min(tm, _round_up(M, 128)), 128)
    M_pad = _round_up(M, tm)
    if M_pad != M:
        x_t = jnp.pad(x_t, ((0, 0), (0, M_pad - M)))
    n_tiles = M_pad // tm

    # --- pass 1: fused relu + matmul + global per-channel sum / sum-of-squares.
    y_t, s, s2 = pl.pallas_call(
        _conv_stats_kernel,
        out_shape=(
            jax.ShapeDtypeStruct((C_out, M_pad), jnp.float32),
            jax.ShapeDtypeStruct((C_out, 1), jnp.float32),
            jax.ShapeDtypeStruct((C_out, 1), jnp.float32),
        ),
        grid_spec=pltpu.PrefetchScalarGridSpec(
            num_scalar_prefetch=0,
            grid=(n_tiles,),
            in_specs=[
                pl.BlockSpec((K, tm), lambda i: (0, i)),
                pl.BlockSpec((C_out, K), lambda i: (0, 0)),
            ],
            out_specs=[
                pl.BlockSpec((C_out, tm), lambda i: (0, i)),
                pl.BlockSpec((C_out, 1), lambda i: (0, 0)),   # VMEM-resident accumulator
                pl.BlockSpec((C_out, 1), lambda i: (0, 0)),   # VMEM-resident accumulator
            ],
        ),
        compiler_params=pltpu.CompilerParams(
            dimension_semantics=("arbitrary",),               # stats accumulate across tiles
            vmem_limit_bytes=_VMEM_LIMIT,
        ),
    )(x_t, w_t)

    # --- fold BN stats + affine into one per-channel scale/shift (tiny vectors).
    mean = s[:, 0] / M
    var = s2[:, 0] / M - mean * mean                          # biased variance (train-mode BN)
    scale = gamma.astype(jnp.float32) * jax.lax.rsqrt(var + BN_EPS)
    shift = beta.astype(jnp.float32) - mean * scale
    scale = scale.reshape(C_out, 1)
    shift = shift.reshape(C_out, 1)

    # --- pass 2: per-element fused multiply-add ("parallel" -> both TCs on v7x).
    out_t = pl.pallas_call(
        _normalize_kernel,
        out_shape=jax.ShapeDtypeStruct((C_out, M_pad), jnp.float32),
        grid_spec=pltpu.PrefetchScalarGridSpec(
            num_scalar_prefetch=0,
            grid=(n_tiles,),
            in_specs=[
                pl.BlockSpec((C_out, tm), lambda i: (0, i)),
                pl.BlockSpec((C_out, 1), lambda i: (0, 0)),
                pl.BlockSpec((C_out, 1), lambda i: (0, 0)),
            ],
            out_specs=pl.BlockSpec((C_out, tm), lambda i: (0, i)),
        ),
        compiler_params=pltpu.CompilerParams(
            dimension_semantics=("parallel",),
            vmem_limit_bytes=_VMEM_LIMIT,
        ),
    )(y_t, scale, shift)

    # (C_out, M) -> (C_out, N, Ho, Wo) -> NCHW.
    out = out_t[:, :M].reshape(C_out, N, Ho, Wo)
    return jnp.transpose(out, (1, 0, 2, 3))


def _reference(x_nchw, w1, w2, gamma, beta):
    """Pure-JAX reference mirroring the PyTorch forward (training-mode BN)."""
    x = jnp.maximum(x_nchw, 0.0)

    def conv1x1_s2(xin, w):
        taps = xin[:, :, ::2, ::2]                       # stride 2
        return jnp.einsum('ncHW,oc->noHW', taps, w.reshape(w.shape[0], w.shape[1]))

    y1 = conv1x1_s2(x, w1)
    y2 = conv1x1_s2(x[:, :, 1:, 1:], w2)
    y = jnp.concatenate([y1, y2], axis=1)
    mean = jnp.mean(y, axis=(0, 2, 3), keepdims=True)
    var = jnp.mean((y - mean) ** 2, axis=(0, 2, 3), keepdims=True)
    y_hat = (y - mean) / jnp.sqrt(var + BN_EPS)
    return y_hat * gamma.reshape(1, -1, 1, 1) + beta.reshape(1, -1, 1, 1)


if __name__ == "__main__":
    def run_case(N, C_in, H, W, C_out, tm):
        C_half = C_out // 2
        key = jax.random.PRNGKey(0)
        kx, k1, k2, kg, kb = jax.random.split(key, 5)
        x = jax.random.normal(kx, (N, C_in, H, W), dtype=jnp.float32)
        w1 = jax.random.normal(k1, (C_half, C_in, 1, 1), dtype=jnp.float32) * 0.1
        w2 = jax.random.normal(k2, (C_half, C_in, 1, 1), dtype=jnp.float32) * 0.1
        gamma = 1.0 + 0.1 * jax.random.normal(kg, (C_out,), dtype=jnp.float32)  # affine=True
        beta = 0.1 * jax.random.normal(kb, (C_out,), dtype=jnp.float32)

        out = jax.block_until_ready(factorized_reduce(x, w1, w2, gamma, beta, tm=tm))
        ref = jax.block_until_ready(_reference(x, w1, w2, gamma, beta))
        assert out.shape == (N, C_out, H // 2, W // 2), out.shape
        np.testing.assert_allclose(np.asarray(out), np.asarray(ref), rtol=1e-4, atol=1e-4)

    # Primary toy shape (single tile).
    run_case(2, 4, 16, 16, 8, tm=128)
    # Multi-tile grid: exercises the cross-tile global-stats accumulation and the
    # zero-column padding path (M = 162 -> padded to 256), plus non-power-of-two channels.
    run_case(2, 6, 18, 18, 10, tm=128)

    print("KERNEL_OK")
</pallas_src>

<mosaic_0001>
module attributes {stable_mosaic.version = 11 : i64} {
  func.func @_conv_stats_kernel(%arg0: i32, %arg1: memref<8x128xf32, #tpu.memory_space<vmem>>, %arg2: memref<8x8xf32, #tpu.memory_space<vmem>>, %arg3: memref<8x128xf32, #tpu.memory_space<vmem>>, %arg4: memref<8x1xf32, #tpu.memory_space<vmem>>, %arg5: memref<8x1xf32, #tpu.memory_space<vmem>>) attributes {dimension_semantics = [#tpu.dimension_semantics<arbitrary>], iteration_bounds = array<i64: 1>, scalar_prefetch = 0 : i64, scratch_operands = 0 : i64, tpu.core_type = #tpu.core_type<tc>, window_params = [{transform_indices = @transform_0, window_bounds = array<i64: 8, 128>}, {pipeline_mode = #tpu.pipeline_mode<synchronous>, transform_indices = @transform_1, window_bounds = array<i64: 8, 8>}, {transform_indices = @transform_2, window_bounds = array<i64: 8, 128>}, {pipeline_mode = #tpu.pipeline_mode<synchronous>, transform_indices = @transform_3, window_bounds = array<i64: 8, 1>}, {pipeline_mode = #tpu.pipeline_mode<synchronous>, transform_indices = @transform_4, window_bounds = array<i64: 8, 1>}]} {
    %c0_i32 = arith.constant 0 : i32
    %0 = arith.cmpi eq, %arg0, %c0_i32 : i32
    %1 = arith.extui %0 : i1 to i32
    %c0_i32_0 = arith.constant 0 : i32
    %2 = arith.cmpi ne, %1, %c0_i32_0 : i32
    scf.if %2 {
      %cst_17 = arith.constant 0.000000e+00 : f32
      %20 = vector.broadcast %cst_17 : f32 to vector<8x1xf32>
      %c0_18 = arith.constant 0 : index
      %c0_19 = arith.constant 0 : index
      %21 = vector.load %arg4[%c0_18, %c0_19] : memref<8x1xf32, #tpu.memory_space<vmem>>, vector<8x1xf32>
      tpu.vector_store %arg4[%c0_18, %c0_19], %20 {strides = array<i32>} : memref<8x1xf32, #tpu.memory_space<vmem>>, vector<8x1xf32>,
      %cst_20 = arith.constant 0.000000e+00 : f32
      %22 = vector.broadcast %cst_20 : f32 to vector<8x1xf32>
      %c0_21 = arith.constant 0 : index
      %c0_22 = arith.constant 0 : index
      %23 = vector.load %arg5[%c0_21, %c0_22] : memref<8x1xf32, #tpu.memory_space<vmem>>, vector<8x1xf32>
      tpu.vector_store %arg5[%c0_21, %c0_22], %22 {strides = array<i32>} : memref<8x1xf32, #tpu.memory_space<vmem>>, vector<8x1xf32>,
    } else {
    }
    %c0 = arith.constant 0 : index
    %c0_1 = arith.constant 0 : index
    %3 = vector.load %arg1[%c0, %c0_1] : memref<8x128xf32, #tpu.memory_space<vmem>>, vector<8x128xf32>
    %cst = arith.constant 0.000000e+00 : f32
    %4 = vector.broadcast %cst : f32 to vector<8x128xf32>
    %5 = arith.maximumf %3, %4 : vector<8x128xf32>
    %c0_2 = arith.constant 0 : index
    %c0_3 = arith.constant 0 : index
    %6 = vector.load %arg2[%c0_2, %c0_3] : memref<8x8xf32, #tpu.memory_space<vmem>>, vector<8x8xf32>
    %cst_4 = arith.constant dense<0.000000e+00> : vector<8x128xf32>
    %7 = tpu.matmul %6, %5, %cst_4 {dimension_numbers = #tpu.dot_dimension_numbers<[1], [0], [0], [1], [0, 0, 1, 1], [], []>} : vector<8x8xf32>, vector<8x128xf32>, vector<8x128xf32> -> vector<8x128xf32>
    %c0_5 = arith.constant 0 : index
    %c0_6 = arith.constant 0 : index
    %8 = vector.load %arg3[%c0_5, %c0_6] : memref<8x128xf32, #tpu.memory_space<vmem>>, vector<8x128xf32>
    tpu.vector_store %arg3[%c0_5, %c0_6], %7 {strides = array<i32>} : memref<8x128xf32, #tpu.memory_space<vmem>>, vector<8x128xf32>,
    %c0_7 = arith.constant 0 : index
    %c0_8 = arith.constant 0 : index
    %9 = vector.load %arg4[%c0_7, %c0_8] : memref<8x1xf32, #tpu.memory_space<vmem>>, vector<8x1xf32>
    %cst_9 = arith.constant dense<0.000000e+00> : vector<8xf32>
    %10 = vector.multi_reduction <add>, %7, %cst_9 [1] : vector<8x128xf32> to vector<8xf32>
    %11 = vector.shape_cast %10 : vector<8xf32> to vector<8x1xf32>
    %12 = arith.addf %9, %11 : vector<8x1xf32>
    %c0_10 = arith.constant 0 : index
    %c0_11 = arith.constant 0 : index
    %13 = vector.load %arg4[%c0_10, %c0_11] : memref<8x1xf32, #tpu.memory_space<vmem>>, vector<8x1xf32>
    tpu.vector_store %arg4[%c0_10, %c0_11], %12 {strides = array<i32>} : memref<8x1xf32, #tpu.memory_space<vmem>>, vector<8x1xf32>,
    %c0_12 = arith.constant 0 : index
    %c0_13 = arith.constant 0 : index
    %14 = vector.load %arg5[%c0_12, %c0_13] : memref<8x1xf32, #tpu.memory_space<vmem>>, vector<8x1xf32>
    %15 = arith.mulf %7, %7 : vector<8x128xf32>
    %cst_14 = arith.constant dense<0.000000e+00> : vector<8xf32>
    %16 = vector.multi_reduction <add>, %15, %cst_14 [1] : vector<8x128xf32> to vector<8xf32>
    %17 = vector.shape_cast %16 : vector<8xf32> to vector<8x1xf32>
    %18 = arith.addf %14, %17 : vector<8x1xf32>
    %c0_15 = arith.constant 0 : index
    %c0_16 = arith.constant 0 : index
    %19 = vector.load %arg5[%c0_15, %c0_16] : memref<8x1xf32, #tpu.memory_space<vmem>>, vector<8x1xf32>
    tpu.vector_store %arg5[%c0_15, %c0_16], %18 {strides = array<i32>} : memref<8x1xf32, #tpu.memory_space<vmem>>, vector<8x1xf32>,
    return
  }
  func.func @transform_0(%arg0: i32) -> (i32, i32) {
    %c0_i32 = arith.constant 0 : i32
    %c0_i32_0 = arith.constant 0 : i32
    return %c0_i32, %arg0 : i32, i32
  }
  func.func @transform_1(%arg0: i32) -> (i32, i32) {
    %c0_i32 = arith.constant 0 : i32
    %c0_i32_0 = arith.constant 0 : i32
    %c0_i32_1 = arith.constant 0 : i32
    return %c0_i32, %c0_i32_0 : i32, i32
  }
  func.func @transform_2(%arg0: i32) -> (i32, i32) {
    %c0_i32 = arith.constant 0 : i32
    %c0_i32_0 = arith.constant 0 : i32
    return %c0_i32, %arg0 : i32, i32
  }
  func.func @transform_3(%arg0: i32) -> (i32, i32) {
    %c0_i32 = arith.constant 0 : i32
    %c0_i32_0 = arith.constant 0 : i32
    %c0_i32_1 = arith.constant 0 : i32
    return %c0_i32, %c0_i32_0 : i32, i32
  }
  func.func @transform_4(%arg0: i32) -> (i32, i32) {
    %c0_i32 = arith.constant 0 : i32
    %c0_i32_0 = arith.constant 0 : i32
    %c0_i32_1 = arith.constant 0 : i32
    return %c0_i32, %c0_i32_0 : i32, i32
  }
}

</mosaic_0001>

<bundles_post_ra>
// kernel: tpu_custom_call.1
= control target key start
LH: loop header
LB: loop body
LE: loop exit
PB: predicated region body
PF: predicated region fallthrough
CT: control target
= control target key end

     0   :  { %10 = vsyncpa [#allocation3], 0  ;;  %s333_s0 = inlined_call_operand.hbm [shape: f32[8,128], index: 0, kind: input, shape index: {}]   ;;  %s334_s1 = inlined_call_operand.hbm [shape: f32[8,8], index: 1, kind: input, shape index: {}]   ;;  %s335_s2 = inlined_call_operand.hbm [shape: f32[8,128], index: 2, kind: output, shape index: {0}]   ;;  %s336_s3 = inlined_call_operand.vmem [shape: f32[8,1], index: 3, kind: output, shape index: {1}]   ;;  %s337_s4 = inlined_call_operand.vmem [shape: f32[8,1], index: 4, kind: output, shape index: {2}]  }
   0x1   :  { %11 = vsyncpa [#allocation6], 0 }
   0x2   :  { %12 = vsyncpa [#allocation4], 0  ;;  %s245_s15 = smov [#allocation2]   ;;  %s246_s17 = smov [#allocation5]  }
   0x3   :  { %s19_s16 = sshll.u32 %s245_s15, 4  ;;  %s29_s18 = sshll.u32 %s246_s17, 4  ;;  %s20_s16 = int_to_ptr.vmem [resolvable:$true] %s19_s16  ;;  %s30_s18 = int_to_ptr.vmem [resolvable:$true] %s29_s18 }
   0x4   :  { %s173_s21 = scalar_lea.hbm %s333_s0, 128 }
   0x5   :  { %p174_p0 = scmp.ne.s32.totalorder %s333_s0, %s173_s21  ;;  %p177_p1 = scmp.lt.u32.totalorder %s173_s21, %s333_s0 }
   0x7   :  { %p179_p2 = pnand %p177_p1, %p174_p0 }
   0x9   :  { %182 = shalt.err (!%p179_p2)
}
   0xa   :  { %s183_s26 = scalar_lea.vmem %s20_s16, 128  ;;  %p188_p4 = scmp.lt.s32.totalorder %s20_s16, %s20_s16 }
   0xb   :  { %p184_p3 = scmp.ne.s32.totalorder %s20_s16, %s183_s26  ;;  %p189_p5 = scmp.lt.s32.totalorder %s183_s26, %s183_s26 }
   0xd   :  { %p190_p6 = por %p189_p5, %p188_p4 }
   0xf   :  { %p191_p7 = pnand %p190_p6, %p184_p3 }
  0x11   :  { %194 = shalt.err (!%p191_p7)
}
  0x12   :  { %22 = dma.hbm_to_vmem [thread:$0]  %s333_s0, 128, %s20_s16, [#allocation3]  }
  0x13   :  { %s195_s5 = scalar_lea.hbm %s334_s1, 128 }
  0x14   :  { %p196_p8 = scmp.ne.s32.totalorder %s334_s1, %s195_s5  ;;  %p199_p9 = scmp.lt.u32.totalorder %s195_s5, %s334_s1 }
  0x16   :  { %p201_p10 = pnand %p199_p9, %p196_p8 }
  0x18   :  { %204 = shalt.err (!%p201_p10)
}
  0x19   :  { %s205_s10 = scalar_lea.vmem %s30_s18, 128  ;;  %p210_p12 = scmp.lt.s32.totalorder %s30_s18, %s30_s18 }
  0x1a   :  { %p206_p11 = scmp.ne.s32.totalorder %s30_s18, %s205_s10  ;;  %p211_p13 = scmp.lt.s32.totalorder %s205_s10, %s205_s10 }
  0x1c   :  { %p212_p0 = por %p211_p13, %p210_p12 }
  0x1e   :  { %p213_p1 = pnand %p212_p0, %p206_p11 }
  0x20   :  { %216 = shalt.err (!%p213_p1)
}
  0x21   :  { %32 = dma.hbm_to_vmem [thread:$0]  %s334_s1, 128, %s30_s18, [#allocation6]  }
  0x22   :  { %239 = dma.done.wait [#allocation3], 128  }
  0x23   :  { %240 = vsyncadd [#allocation3], 4294967168 }
  0x24   :  { %241 = dma.done.wait [#allocation6], 128  }
  0x25   :  { %242 = vsyncadd [#allocation6], 4294967168  ;;  %vm43_vm0 = vcmask 7168   ;;  %v247_v0 = vmov 0.0   ;;  %vm248_vm1 = vmmov 0   ;;  %v46_v1 = vld [vmem:[#allocation2] sm:$0xff] }
  0x26   :  { %44 = vst.msk [vmem:[%s336_s3] sm:$0xff] %vm43_vm0, %v247_v0  ;;  %45 = vst.msk [vmem:[%s337_s4] sm:$0xff] %vm43_vm0, %v247_v0  ;;  %163 = vmatprep.subr.mxu0 %v247_v0  ;;  %165 = vmatprep.mubr.msk.f32.mxu0 %vm248_vm1, %v247_v0  ;;  %v47_v2 = vmax.f32 %v46_v1, 0.0  ;;  %v48_v3 = vld [vmem:[#allocation5] sm:$0xff]  ;;  %vm49_vm2 = vcmask 64512   ;;  %s249_s1 = smov [#allocation7]  }
  0x27   :  { %s142_s16 = sshll.u32 %s249_s1, 4  ;;  %s143_s16 = int_to_ptr.vmem [resolvable:$true] %s142_s16 }
  0x28   :  { %164 = vmatpush3.msra.mxu0 %v47_v2  ;;  %s217_s17 = scalar_lea.vmem %s143_s16, 128  ;;  %p222_p3 = scmp.lt.s32.totalorder %s143_s16, %s143_s16 }
  0x29   :  { %166 = vmatmul.mubr.msk.f32.vlgmr.msra.gmra.mrb[0].mxu0 %vm49_vm2, %v48_v3  ;;  %p218_p2 = scmp.ne.s32.totalorder %s143_s16, %s217_s17  ;;  %p223_p4 = scmp.lt.s32.totalorder %s217_s17, %s217_s17 }
  0x2b   :  { %p224_p5 = por %p223_p4, %p222_p3 }
  0x2d   :  { %p225_p6 = pnand %p224_p5, %p218_p2 }
  0xfc   :  { %v119_v4 = vpop.f32.mrb[0].mxu0 }
  0xfd   :  { %123 = vst [vmem:[#allocation7] sm:$0xff] %v119_v4  ;;  %125 = vadd.xlane.f32.xlu0 %v119_v4  ;;  %v167_v5 = vpop.f32.mrb[1].mxu0  ;;  %v131_v6 = vmul.f32 %v119_v4, %v119_v4 }
 0x101   :  { %132 = vadd.xlane.f32.xlu0 %v131_v6 }
 0x102   :  { %228 = shalt.err (!%p225_p6)
}
 0x103   :  { %s229_s20 = scalar_lea.hbm %s335_s2, 128 }
 0x104   :  { %p230_p7 = scmp.ne.s32.totalorder %s335_s2, %s229_s20  ;;  %p233_p8 = scmp.lt.u32.totalorder %s229_s20, %s335_s2 }
 0x106   :  { %p235_p9 = pnand %p233_p8, %p230_p7 }
 0x108   :  { %238 = shalt.err (!%p235_p9)
}
 0x109   :  { %145 = dma.vmem_to_hbm [thread:$0]  %s143_s16, 128, %s335_s2, [#allocation4]   ;;  %v124_v7 = vld [vmem:[%s336_s3] sm:$0xff] }
 0x10a   :  { %v130_v10 = vld [vmem:[%s337_s4] sm:$0xff] }
 0x18a   :  { %v126_v8 = vpop.xlane.xlu0 %125 }
 0x18b   :  { %v127_v9 = vadd.f32 %v126_v8, %v124_v7 }
 0x18d   :  { %129 = vst.msk [vmem:[%s336_s3] sm:$0xff] %vm43_vm0, %v127_v9 }
 0x18e   :  { %v133_v11 = vpop.xlane.xlu0 %132 }
 0x18f   :  { %v134_v12 = vadd.f32 %v133_v11, %v130_v10 }
 0x191   :  { %135 = vst.msk [vmem:[%s337_s4] sm:$0xff] %vm43_vm0, %v134_v12 }
 0x192   :  { %243 = dma.done.wait [#allocation4], 128  }
 0x193   :  { %244 = vsyncadd [#allocation4], 4294967168 }
 0x194   :  { %157 = vsyncpa [#allocation3], 1 }
 0x195   :  { %158 = vsyncpa [#allocation6], 1 }
 0x196   :  { %159 = vsyncpa [#allocation4], 1 }

</bundles_post_ra>
